<compile_context>
chip_gen: v5e
topology: v5e:2x2
jax: 0.10.0
libtpu: 0.0.40
codegen_flags: <defaults>
</compile_context>

<pallas_src>
import functools

import jax
import jax.numpy as jnp
import numpy as np
from jax.experimental import pallas as pl
from jax.experimental.pallas import tpu as pltpu


# ----------------------------------------------------------------------------
# Pallas kernel: whole encoder layer for one batch element.
# ----------------------------------------------------------------------------
def _encoder_layer_kernel(
    src_ref,                                   # (1, S, E)  f32
    wqkv_ref, bqkv_ref,                        # (E, 3E) bf16 , (1, 3E) f32
    wo_ref, bo_ref,                            # (E, E)  bf16 , (1, E)  f32
    w1_ref, b1_ref,                            # (E, F)  bf16 , (1, F)  f32
    w2_ref, b2_ref,                            # (F, E)  bf16 , (1, E)  f32
    g1_ref, be1_ref, g2_ref, be2_ref,          # (1, E)  f32
    out_ref,                                   # (1, S, E)  f32
    attn_ref,                                  # (1, S, S)  f32
    *, nhead, eps,
):
    f32 = jnp.float32
    bf16 = jnp.bfloat16

    x = src_ref[0]                              # (S, E) f32
    S, E = x.shape
    H = nhead
    Dh = E // H

    # --- fused QKV projection: one lane-dense (S,E)@(E,3E) matmul ------------
    # (scale 1/sqrt(Dh) is already folded into the Q columns / Q bias)
    qkv = jnp.dot(x.astype(bf16), wqkv_ref[...], preferred_element_type=f32)
    qkv = (qkv + bqkv_ref[...]).astype(bf16)    # cast once, right after bias

    # --- split into per-head (H, S, Dh) operands (static lane slices) --------
    def heads(base):
        return jnp.stack(
            [qkv[:, base + h * Dh:base + (h + 1) * Dh] for h in range(H)],
            axis=0)

    qh = heads(0)
    kh = heads(E)
    vh = heads(2 * E)

    # --- scaled dot-product attention, all heads batched on the MXU ----------
    s = jnp.einsum("hqd,hkd->hqk", qh, kh, preferred_element_type=f32)  # (H,S,S)
    m = jnp.max(s, axis=-1, keepdims=True)
    p = jnp.exp(s - m)
    denom = jnp.sum(p, axis=-1, keepdims=True)
    p = p * pl.reciprocal(denom, approx=True)    # softmax (EUP reciprocal)

    attn_ref[0] = jnp.mean(p, axis=0)            # head-averaged weights (S,S)

    ctx = jnp.einsum("hqk,hkd->hqd", p.astype(bf16), vh,
                     preferred_element_type=f32)  # (H, S, Dh) f32
    ctx16 = ctx.astype(bf16)

    # --- merge heads (lane concat) + single K=E output projection ------------
    ctx_cat = jnp.concatenate([ctx16[h] for h in range(H)], axis=-1)   # (S, E)
    attn_out = jnp.dot(ctx_cat, wo_ref[...],
                       preferred_element_type=f32) + bo_ref[...]       # (S, E)

    # --- residual + LayerNorm 1 (dropout1 = identity; two-pass variance) -----
    x1 = x + attn_out
    mu1 = jnp.mean(x1, axis=-1, keepdims=True)
    xc1 = x1 - mu1
    var1 = jnp.mean(xc1 * xc1, axis=-1, keepdims=True)
    x1n = xc1 * jax.lax.rsqrt(var1 + eps) * g1_ref[...] + be1_ref[...]

    # --- feed-forward (ReLU; dropout = identity in eval) ---------------------
    h1 = jnp.dot(x1n.astype(bf16), w1_ref[...], preferred_element_type=f32) + b1_ref[...]
    h1 = jnp.maximum(h1, 0.0)
    y = jnp.dot(h1.astype(bf16), w2_ref[...], preferred_element_type=f32) + b2_ref[...]

    # --- residual + LayerNorm 2 ----------------------------------------------
    x2 = x1n + y
    mu2 = jnp.mean(x2, axis=-1, keepdims=True)
    xc2 = x2 - mu2
    var2 = jnp.mean(xc2 * xc2, axis=-1, keepdims=True)
    out_ref[0] = xc2 * jax.lax.rsqrt(var2 + eps) * g2_ref[...] + be2_ref[...]


# ----------------------------------------------------------------------------
# Host-side, one-time parameter restructuring (fused QKV, bf16 weights,
# scale folded into Q).
# ----------------------------------------------------------------------------
def _prepare_params(params, scale):
    f32 = jnp.float32
    bf16 = jnp.bfloat16
    wqkv = jnp.concatenate(
        [params["wq_t"] * scale, params["wk_t"], params["wv_t"]], axis=1).astype(bf16)
    bqkv = jnp.concatenate(
        [params["bq"] * scale, params["bk"], params["bv"]], axis=1).astype(f32)
    return (
        wqkv, bqkv,
        params["wo_t"].astype(bf16), params["bo"].astype(f32),
        params["w1_t"].astype(bf16), params["b1"].astype(f32),
        params["w2_t"].astype(bf16), params["b2"].astype(f32),
        params["g1"].astype(f32), params["be1"].astype(f32),
        params["g2"].astype(f32), params["be2"].astype(f32),
    )


def _vmem_limit_bytes():
    """Per-generation VMEM limit: ~3/4 of physical, capped; safe fallback."""
    try:
        info = pltpu.get_tpu_info()
        cap = getattr(info, "vmem_capacity_bytes", None)
        if cap:
            return int(min(cap * 3 // 4, 112 * 1024 * 1024))
    except Exception:
        pass
    return 32 * 1024 * 1024


# ----------------------------------------------------------------------------
# Wrapper
# ----------------------------------------------------------------------------
def transformer_encoder_layer(src, params, *, nhead, eps=1e-5):
    """src: (S, B, E) f32 (PyTorch seq-first layout). Returns (out, attn)."""
    S, B, E = src.shape
    Dh = E // nhead
    scale = 1.0 / float(np.sqrt(Dh))

    # (S,B,E)<->(B,S,E) transposes stay outside the kernel (negligible here);
    # batch-first blocks keep every BlockSpec's last two dims equal to the
    # full array dims (layout-safe on all generations).
    x = jnp.transpose(src, (1, 0, 2))          # (B, S, E)

    flat = _prepare_params(params, scale)

    def const_spec(a):
        # Constant block index -> weight fetched once, VMEM-resident.
        return pl.BlockSpec(a.shape, lambda b, _n=a.ndim: (0,) * _n)

    in_specs = [pl.BlockSpec((1, S, E), lambda b: (b, 0, 0))]
    in_specs += [const_spec(a) for a in flat]

    out, attn = pl.pallas_call(
        functools.partial(_encoder_layer_kernel, nhead=nhead, eps=eps),
        out_shape=(
            jax.ShapeDtypeStruct((B, S, E), jnp.float32),
            jax.ShapeDtypeStruct((B, S, S), jnp.float32),
        ),
        grid=(B,),
        in_specs=in_specs,
        out_specs=[
            pl.BlockSpec((1, S, E), lambda b: (b, 0, 0)),
            pl.BlockSpec((1, S, S), lambda b: (b, 0, 0)),
        ],
        compiler_params=pltpu.CompilerParams(
            dimension_semantics=("parallel",),
            vmem_limit_bytes=_vmem_limit_bytes()),
    )(x, *flat)

    return jnp.transpose(out, (1, 0, 2)), attn  # back to (S, B, E)


# ----------------------------------------------------------------------------
# Pure-JAX reference (same math / same bf16-at-the-dots / same scale folding).
# ----------------------------------------------------------------------------
def _reference(src, params, *, nhead, eps=1e-5):
    bf16 = jnp.bfloat16
    x = jnp.transpose(src, (1, 0, 2)).astype(jnp.float32)   # (B, S, E)
    B, S, E = x.shape
    Dh = E // nhead
    scale = 1.0 / float(np.sqrt(Dh))

    def mm(a, w):   # bf16 operands, f32 accumulation (mirrors the kernel)
        return jnp.dot(a.astype(bf16), w.astype(bf16), preferred_element_type=jnp.float32)

    q = mm(x, params["wq_t"] * scale) + params["bq"] * scale
    k = mm(x, params["wk_t"]) + params["bk"]
    v = mm(x, params["wv_t"]) + params["bv"]

    def heads(t):
        return t.reshape(B, S, nhead, Dh).transpose(0, 2, 1, 3)  # (B, H, S, Dh)

    qh, kh, vh = heads(q), heads(k), heads(v)
    s = jnp.einsum("bhqd,bhkd->bhqk", qh.astype(bf16), kh.astype(bf16),
                   preferred_element_type=jnp.float32)
    p = jax.nn.softmax(s, axis=-1)
    attn_w = jnp.mean(p, axis=1)                                  # (B, S, S)
    ctx = jnp.einsum("bhqk,bhkd->bhqd", p.astype(bf16), vh.astype(bf16),
                     preferred_element_type=jnp.float32)
    ctx = ctx.transpose(0, 2, 1, 3).reshape(B, S, E)
    attn_out = mm(ctx, params["wo_t"]) + params["bo"]

    def ln(t, g, b):
        mu = jnp.mean(t, axis=-1, keepdims=True)
        var = jnp.mean((t - mu) ** 2, axis=-1, keepdims=True)
        return (t - mu) * jax.lax.rsqrt(var + eps) * g + b

    x1 = ln(x + attn_out, params["g1"], params["be1"])
    h1 = jnp.maximum(mm(x1, params["w1_t"]) + params["b1"], 0.0)
    y = mm(h1, params["w2_t"]) + params["b2"]
    x2 = ln(x1 + y, params["g2"], params["be2"])
    return jnp.transpose(x2, (1, 0, 2)), attn_w


# ----------------------------------------------------------------------------
# Deterministic parameter init (shapes from the module's __init__).
# ----------------------------------------------------------------------------
def make_params(key, d_model, dim_feedforward):
    ks = jax.random.split(key, 8)
    s = 0.05
    return {
        # MultiheadAttention in_proj split into Q/K/V, stored pre-transposed
        "wq_t": s * jax.random.normal(ks[0], (d_model, d_model), jnp.float32),
        "wk_t": s * jax.random.normal(ks[1], (d_model, d_model), jnp.float32),
        "wv_t": s * jax.random.normal(ks[2], (d_model, d_model), jnp.float32),
        "bq": s * jax.random.normal(ks[3], (1, d_model), jnp.float32),
        "bk": jnp.zeros((1, d_model), jnp.float32),
        "bv": jnp.zeros((1, d_model), jnp.float32),
        "wo_t": s * jax.random.normal(ks[4], (d_model, d_model), jnp.float32),
        "bo": jnp.zeros((1, d_model), jnp.float32),
        # FFN
        "w1_t": s * jax.random.normal(ks[5], (d_model, dim_feedforward), jnp.float32),
        "b1": s * jax.random.normal(ks[6], (1, dim_feedforward), jnp.float32),
        "w2_t": s * jax.random.normal(ks[7], (dim_feedforward, d_model), jnp.float32),
        "b2": jnp.zeros((1, d_model), jnp.float32),
        # LayerNorms
        "g1": jnp.ones((1, d_model), jnp.float32),
        "be1": jnp.zeros((1, d_model), jnp.float32),
        "g2": jnp.ones((1, d_model), jnp.float32),
        "be2": jnp.zeros((1, d_model), jnp.float32),
    }


if __name__ == "__main__":
    # Small shapes consistent with the module: seq=8, batch=2, d_model=32,
    # nhead=4, dim_feedforward=64.
    S, B, D_MODEL, NHEAD, DIM_FF = 8, 2, 32, 4, 64

    key = jax.random.PRNGKey(0)
    k_src, k_par = jax.random.split(key)
    src = jax.random.normal(k_src, (S, B, D_MODEL), jnp.float32)
    params = make_params(k_par, D_MODEL, DIM_FF)

    out, attn = transformer_encoder_layer(src, params, nhead=NHEAD)
    out = jax.block_until_ready(out)
    attn = jax.block_until_ready(attn)

    out_ref, attn_ref = _reference(src, params, nhead=NHEAD)

    assert out.shape == (S, B, D_MODEL)
    assert attn.shape == (B, S, S)
    np.testing.assert_allclose(np.asarray(out), np.asarray(out_ref),
                               atol=2e-3, rtol=2e-3)
    np.testing.assert_allclose(np.asarray(attn), np.asarray(attn_ref),
                               atol=2e-3, rtol=2e-3)
    print("KERNEL_OK")
</pallas_src>

<mosaic_0001>
module attributes {stable_mosaic.version = 11 : i64} {
  func.func @_encoder_layer_kernel(%arg0: i32, %arg1: memref<1x8x32xf32, #tpu.memory_space<vmem>>, %arg2: memref<32x96xbf16, #tpu.memory_space<vmem>>, %arg3: memref<1x96xf32, #tpu.memory_space<vmem>>, %arg4: memref<32x32xbf16, #tpu.memory_space<vmem>>, %arg5: memref<1x32xf32, #tpu.memory_space<vmem>>, %arg6: memref<32x64xbf16, #tpu.memory_space<vmem>>, %arg7: memref<1x64xf32, #tpu.memory_space<vmem>>, %arg8: memref<64x32xbf16, #tpu.memory_space<vmem>>, %arg9: memref<1x32xf32, #tpu.memory_space<vmem>>, %arg10: memref<1x32xf32, #tpu.memory_space<vmem>>, %arg11: memref<1x32xf32, #tpu.memory_space<vmem>>, %arg12: memref<1x32xf32, #tpu.memory_space<vmem>>, %arg13: memref<1x32xf32, #tpu.memory_space<vmem>>, %arg14: memref<1x8x32xf32, #tpu.memory_space<vmem>>, %arg15: memref<1x8x8xf32, #tpu.memory_space<vmem>>) attributes {dimension_semantics = [#tpu.dimension_semantics<parallel>], iteration_bounds = array<i64: 2>, scalar_prefetch = 0 : i64, scratch_operands = 0 : i64, tpu.core_type = #tpu.core_type<tc>, window_params = [{transform_indices = @transform_0, window_bounds = array<i64: 1, 8, 32>}, {pipeline_mode = #tpu.pipeline_mode<synchronous>, transform_indices = @transform_1, window_bounds = array<i64: 32, 96>}, {pipeline_mode = #tpu.pipeline_mode<synchronous>, transform_indices = @transform_2, window_bounds = array<i64: 1, 96>}, {pipeline_mode = #tpu.pipeline_mode<synchronous>, transform_indices = @transform_3, window_bounds = array<i64: 32, 32>}, {pipeline_mode = #tpu.pipeline_mode<synchronous>, transform_indices = @transform_4, window_bounds = array<i64: 1, 32>}, {pipeline_mode = #tpu.pipeline_mode<synchronous>, transform_indices = @transform_5, window_bounds = array<i64: 32, 64>}, {pipeline_mode = #tpu.pipeline_mode<synchronous>, transform_indices = @transform_6, window_bounds = array<i64: 1, 64>}, {pipeline_mode = #tpu.pipeline_mode<synchronous>, transform_indices = @transform_7, window_bounds = array<i64: 64, 32>}, {pipeline_mode = #tpu.pipeline_mode<synchronous>, transform_indices = @transform_8, window_bounds = array<i64: 1, 32>}, {pipeline_mode = #tpu.pipeline_mode<synchronous>, transform_indices = @transform_9, window_bounds = array<i64: 1, 32>}, {pipeline_mode = #tpu.pipeline_mode<synchronous>, transform_indices = @transform_10, window_bounds = array<i64: 1, 32>}, {pipeline_mode = #tpu.pipeline_mode<synchronous>, transform_indices = @transform_11, window_bounds = array<i64: 1, 32>}, {pipeline_mode = #tpu.pipeline_mode<synchronous>, transform_indices = @transform_12, window_bounds = array<i64: 1, 32>}, {transform_indices = @transform_13, window_bounds = array<i64: 1, 8, 32>}, {transform_indices = @transform_14, window_bounds = array<i64: 1, 8, 8>}]} {
    %c0 = arith.constant 0 : index
    %c0_0 = arith.constant 0 : index
    %c0_1 = arith.constant 0 : index
    %0 = vector.load %arg1[%c0, %c0_0, %c0_1] : memref<1x8x32xf32, #tpu.memory_space<vmem>>, vector<1x8x32xf32>
    %1 = vector.shape_cast %0 : vector<1x8x32xf32> to vector<8x32xf32>
    %2 = arith.truncf %1 : vector<8x32xf32> to vector<8x32xbf16>
    %c0_2 = arith.constant 0 : index
    %c0_3 = arith.constant 0 : index
    %3 = vector.load %arg2[%c0_2, %c0_3] : memref<32x96xbf16, #tpu.memory_space<vmem>>, vector<32x96xbf16>
    %cst = arith.constant dense<0.000000e+00> : vector<8x96xf32>
    %4 = tpu.matmul %2, %3, %cst {dimension_numbers = #tpu.dot_dimension_numbers<[1], [0], [0], [1], [0, 0, 1, 1], [], []>} : vector<8x32xbf16>, vector<32x96xbf16>, vector<8x96xf32> -> vector<8x96xf32>
    %c0_4 = arith.constant 0 : index
    %c0_5 = arith.constant 0 : index
    %5 = vector.load %arg3[%c0_4, %c0_5] : memref<1x96xf32, #tpu.memory_space<vmem>>, vector<1x96xf32>
    %6 = vector.broadcast %5 : vector<1x96xf32> to vector<8x96xf32>
    %7 = arith.addf %4, %6 : vector<8x96xf32>
    %8 = arith.truncf %7 : vector<8x96xf32> to vector<8x96xbf16>
    %9 = vector.extract_strided_slice %8 {offsets = [0, 0], sizes = [8, 8], strides = [1, 1]} : vector<8x96xbf16> to vector<8x8xbf16>
    %10 = vector.extract_strided_slice %8 {offsets = [0, 8], sizes = [8, 8], strides = [1, 1]} : vector<8x96xbf16> to vector<8x8xbf16>
    %11 = vector.extract_strided_slice %8 {offsets = [0, 16], sizes = [8, 8], strides = [1, 1]} : vector<8x96xbf16> to vector<8x8xbf16>
    %12 = vector.extract_strided_slice %8 {offsets = [0, 24], sizes = [8, 8], strides = [1, 1]} : vector<8x96xbf16> to vector<8x8xbf16>
    %13 = vector.shape_cast %9 : vector<8x8xbf16> to vector<1x8x8xbf16>
    %14 = vector.shape_cast %10 : vector<8x8xbf16> to vector<1x8x8xbf16>
    %15 = vector.shape_cast %11 : vector<8x8xbf16> to vector<1x8x8xbf16>
    %16 = vector.shape_cast %12 : vector<8x8xbf16> to vector<1x8x8xbf16>
    %17 = tpu.concatenate %13, %14, %15, %16 in 0 : vector<1x8x8xbf16>, vector<1x8x8xbf16>, vector<1x8x8xbf16>, vector<1x8x8xbf16> -> vector<4x8x8xbf16>
    %18 = vector.extract_strided_slice %8 {offsets = [0, 32], sizes = [8, 8], strides = [1, 1]} : vector<8x96xbf16> to vector<8x8xbf16>
    %19 = vector.extract_strided_slice %8 {offsets = [0, 40], sizes = [8, 8], strides = [1, 1]} : vector<8x96xbf16> to vector<8x8xbf16>
    %20 = vector.extract_strided_slice %8 {offsets = [0, 48], sizes = [8, 8], strides = [1, 1]} : vector<8x96xbf16> to vector<8x8xbf16>
    %21 = vector.extract_strided_slice %8 {offsets = [0, 56], sizes = [8, 8], strides = [1, 1]} : vector<8x96xbf16> to vector<8x8xbf16>
    %22 = vector.shape_cast %18 : vector<8x8xbf16> to vector<1x8x8xbf16>
    %23 = vector.shape_cast %19 : vector<8x8xbf16> to vector<1x8x8xbf16>
    %24 = vector.shape_cast %20 : vector<8x8xbf16> to vector<1x8x8xbf16>
    %25 = vector.shape_cast %21 : vector<8x8xbf16> to vector<1x8x8xbf16>
    %26 = tpu.concatenate %22, %23, %24, %25 in 0 : vector<1x8x8xbf16>, vector<1x8x8xbf16>, vector<1x8x8xbf16>, vector<1x8x8xbf16> -> vector<4x8x8xbf16>
    %27 = vector.extract_strided_slice %8 {offsets = [0, 64], sizes = [8, 8], strides = [1, 1]} : vector<8x96xbf16> to vector<8x8xbf16>
    %28 = vector.extract_strided_slice %8 {offsets = [0, 72], sizes = [8, 8], strides = [1, 1]} : vector<8x96xbf16> to vector<8x8xbf16>
    %29 = vector.extract_strided_slice %8 {offsets = [0, 80], sizes = [8, 8], strides = [1, 1]} : vector<8x96xbf16> to vector<8x8xbf16>
    %30 = vector.extract_strided_slice %8 {offsets = [0, 88], sizes = [8, 8], strides = [1, 1]} : vector<8x96xbf16> to vector<8x8xbf16>
    %31 = vector.shape_cast %27 : vector<8x8xbf16> to vector<1x8x8xbf16>
    %32 = vector.shape_cast %28 : vector<8x8xbf16> to vector<1x8x8xbf16>
    %33 = vector.shape_cast %29 : vector<8x8xbf16> to vector<1x8x8xbf16>
    %34 = vector.shape_cast %30 : vector<8x8xbf16> to vector<1x8x8xbf16>
    %35 = tpu.concatenate %31, %32, %33, %34 in 0 : vector<1x8x8xbf16>, vector<1x8x8xbf16>, vector<1x8x8xbf16>, vector<1x8x8xbf16> -> vector<4x8x8xbf16>
    "tpu.trace_start"() <{level = 10 : i32, message = "hqd,hkd->hqk"}> : () -> ()
    %cst_6 = arith.constant dense<0.000000e+00> : vector<4x8x8xf32>
    %36 = tpu.matmul %17, %26, %cst_6 {dimension_numbers = #tpu.dot_dimension_numbers<[2], [2], [1], [1], [0, 0, 0, 1, 1, 1], [0], [0]>} : vector<4x8x8xbf16>, vector<4x8x8xbf16>, vector<4x8x8xf32> -> vector<4x8x8xf32>
    "tpu.trace_stop"() : () -> ()
    %cst_7 = arith.constant dense<0xFF800000> : vector<4x8xf32>
    %37 = vector.multi_reduction <maximumf>, %36, %cst_7 [2] : vector<4x8x8xf32> to vector<4x8xf32>
    %38 = vector.shape_cast %37 : vector<4x8xf32> to vector<4x8x1xf32>
    %39 = vector.broadcast %38 : vector<4x8x1xf32> to vector<4x8x8xf32>
    %40 = arith.subf %36, %39 : vector<4x8x8xf32>
    %41 = math.exp %40 : vector<4x8x8xf32>
    %cst_8 = arith.constant dense<0.000000e+00> : vector<4x8xf32>
    %42 = vector.multi_reduction <add>, %41, %cst_8 [2] : vector<4x8x8xf32> to vector<4x8xf32>
    %43 = vector.shape_cast %42 : vector<4x8xf32> to vector<4x8x1xf32>
    %44 = tpu.reciprocal %43 {approx = true} : vector<4x8x1xf32> -> vector<4x8x1xf32>
    %45 = vector.broadcast %44 : vector<4x8x1xf32> to vector<4x8x8xf32>
    %46 = arith.mulf %41, %45 : vector<4x8x8xf32>
    %cst_9 = arith.constant dense<0.000000e+00> : vector<8x8xf32>
    %47 = vector.multi_reduction <add>, %46, %cst_9 [0] : vector<4x8x8xf32> to vector<8x8xf32>
    %cst_10 = arith.constant 4.000000e+00 : f32
    %48 = vector.broadcast %cst_10 : f32 to vector<8x8xf32>
    %49 = arith.divf %47, %48 : vector<8x8xf32>
    %c0_11 = arith.constant 0 : index
    %c0_12 = arith.constant 0 : index
    %c0_13 = arith.constant 0 : index
    %50 = vector.load %arg15[%c0_11, %c0_12, %c0_13] : memref<1x8x8xf32, #tpu.memory_space<vmem>>, vector<1x8x8xf32>
    %51 = vector.shape_cast %50 : vector<1x8x8xf32> to vector<8x8xf32>
    %52 = vector.shape_cast %49 : vector<8x8xf32> to vector<1x8x8xf32>
    tpu.vector_store %arg15[%c0_11, %c0_12, %c0_13], %52 {strides = array<i32>} : memref<1x8x8xf32, #tpu.memory_space<vmem>>, vector<1x8x8xf32>,
    %53 = arith.truncf %46 : vector<4x8x8xf32> to vector<4x8x8xbf16>
    "tpu.trace_start"() <{level = 10 : i32, message = "hqk,hkd->hqd"}> : () -> ()
    %cst_14 = arith.constant dense<0.000000e+00> : vector<4x8x8xf32>
    %54 = tpu.matmul %53, %35, %cst_14 {dimension_numbers = #tpu.dot_dimension_numbers<[2], [1], [1], [2], [0, 0, 0, 1, 1, 2], [0], [0]>} : vector<4x8x8xbf16>, vector<4x8x8xbf16>, vector<4x8x8xf32> -> vector<4x8x8xf32>
    "tpu.trace_stop"() : () -> ()
    %55 = arith.truncf %54 : vector<4x8x8xf32> to vector<4x8x8xbf16>
    %56 = vector.extract_strided_slice %55 {offsets = [0, 0, 0], sizes = [1, 8, 8], strides = [1, 1, 1]} : vector<4x8x8xbf16> to vector<1x8x8xbf16>
    %57 = vector.shape_cast %56 : vector<1x8x8xbf16> to vector<8x8xbf16>
    %58 = vector.extract_strided_slice %55 {offsets = [1, 0, 0], sizes = [1, 8, 8], strides = [1, 1, 1]} : vector<4x8x8xbf16> to vector<1x8x8xbf16>
    %59 = vector.shape_cast %58 : vector<1x8x8xbf16> to vector<8x8xbf16>
    %60 = vector.extract_strided_slice %55 {offsets = [2, 0, 0], sizes = [1, 8, 8], strides = [1, 1, 1]} : vector<4x8x8xbf16> to vector<1x8x8xbf16>
    %61 = vector.shape_cast %60 : vector<1x8x8xbf16> to vector<8x8xbf16>
    %62 = vector.extract_strided_slice %55 {offsets = [3, 0, 0], sizes = [1, 8, 8], strides = [1, 1, 1]} : vector<4x8x8xbf16> to vector<1x8x8xbf16>
    %63 = vector.shape_cast %62 : vector<1x8x8xbf16> to vector<8x8xbf16>
    %64 = tpu.concatenate %57, %59, %61, %63 in 1 : vector<8x8xbf16>, vector<8x8xbf16>, vector<8x8xbf16>, vector<8x8xbf16> -> vector<8x32xbf16>
    %c0_15 = arith.constant 0 : index
    %c0_16 = arith.constant 0 : index
    %65 = vector.load %arg4[%c0_15, %c0_16] : memref<32x32xbf16, #tpu.memory_space<vmem>>, vector<32x32xbf16>
    %cst_17 = arith.constant dense<0.000000e+00> : vector<8x32xf32>
    %66 = tpu.matmul %64, %65, %cst_17 {dimension_numbers = #tpu.dot_dimension_numbers<[1], [0], [0], [1], [0, 0, 1, 1], [], []>} : vector<8x32xbf16>, vector<32x32xbf16>, vector<8x32xf32> -> vector<8x32xf32>
    %c0_18 = arith.constant 0 : index
    %c0_19 = arith.constant 0 : index
    %67 = vector.load %arg5[%c0_18, %c0_19] : memref<1x32xf32, #tpu.memory_space<vmem>>, vector<1x32xf32>
    %68 = vector.broadcast %67 : vector<1x32xf32> to vector<8x32xf32>
    %69 = arith.addf %66, %68 : vector<8x32xf32>
    %70 = arith.addf %1, %69 : vector<8x32xf32>
    %cst_20 = arith.constant dense<0.000000e+00> : vector<8xf32>
    %71 = vector.multi_reduction <add>, %70, %cst_20 [1] : vector<8x32xf32> to vector<8xf32>
    %72 = vector.shape_cast %71 : vector<8xf32> to vector<8x1xf32>
    %cst_21 = arith.constant 3.200000e+01 : f32
    %73 = vector.broadcast %cst_21 : f32 to vector<8x1xf32>
    %74 = arith.divf %72, %73 : vector<8x1xf32>
    %75 = vector.broadcast %74 : vector<8x1xf32> to vector<8x32xf32>
    %76 = arith.subf %70, %75 : vector<8x32xf32>
    %77 = arith.mulf %76, %76 : vector<8x32xf32>
    %cst_22 = arith.constant dense<0.000000e+00> : vector<8xf32>
    %78 = vector.multi_reduction <add>, %77, %cst_22 [1] : vector<8x32xf32> to vector<8xf32>
    %79 = vector.shape_cast %78 : vector<8xf32> to vector<8x1xf32>
    %cst_23 = arith.constant 3.200000e+01 : f32
    %80 = vector.broadcast %cst_23 : f32 to vector<8x1xf32>
    %81 = arith.divf %79, %80 : vector<8x1xf32>
    %cst_24 = arith.constant 9.99999974E-6 : f32
    %82 = vector.broadcast %cst_24 : f32 to vector<8x1xf32>
    %83 = arith.addf %81, %82 : vector<8x1xf32>
    %84 = math.rsqrt %83 : vector<8x1xf32>
    %85 = vector.broadcast %84 : vector<8x1xf32> to vector<8x32xf32>
    %86 = arith.mulf %76, %85 : vector<8x32xf32>
    %c0_25 = arith.constant 0 : index
    %c0_26 = arith.constant 0 : index
    %87 = vector.load %arg10[%c0_25, %c0_26] : memref<1x32xf32, #tpu.memory_space<vmem>>, vector<1x32xf32>
    %88 = vector.broadcast %87 : vector<1x32xf32> to vector<8x32xf32>
    %89 = arith.mulf %86, %88 : vector<8x32xf32>
    %c0_27 = arith.constant 0 : index
    %c0_28 = arith.constant 0 : index
    %90 = vector.load %arg11[%c0_27, %c0_28] : memref<1x32xf32, #tpu.memory_space<vmem>>, vector<1x32xf32>
    %91 = vector.broadcast %90 : vector<1x32xf32> to vector<8x32xf32>
    %92 = arith.addf %89, %91 : vector<8x32xf32>
    %93 = arith.truncf %92 : vector<8x32xf32> to vector<8x32xbf16>
    %c0_29 = arith.constant 0 : index
    %c0_30 = arith.constant 0 : index
    %94 = vector.load %arg6[%c0_29, %c0_30] : memref<32x64xbf16, #tpu.memory_space<vmem>>, vector<32x64xbf16>
    %cst_31 = arith.constant dense<0.000000e+00> : vector<8x64xf32>
    %95 = tpu.matmul %93, %94, %cst_31 {dimension_numbers = #tpu.dot_dimension_numbers<[1], [0], [0], [1], [0, 0, 1, 1], [], []>} : vector<8x32xbf16>, vector<32x64xbf16>, vector<8x64xf32> -> vector<8x64xf32>
    %c0_32 = arith.constant 0 : index
    %c0_33 = arith.constant 0 : index
    %96 = vector.load %arg7[%c0_32, %c0_33] : memref<1x64xf32, #tpu.memory_space<vmem>>, vector<1x64xf32>
    %97 = vector.broadcast %96 : vector<1x64xf32> to vector<8x64xf32>
    %98 = arith.addf %95, %97 : vector<8x64xf32>
    %cst_34 = arith.constant 0.000000e+00 : f32
    %99 = vector.broadcast %cst_34 : f32 to vector<8x64xf32>
    %100 = arith.maximumf %98, %99 : vector<8x64xf32>
    %101 = arith.truncf %100 : vector<8x64xf32> to vector<8x64xbf16>
    %c0_35 = arith.constant 0 : index
    %c0_36 = arith.constant 0 : index
    %102 = vector.load %arg8[%c0_35, %c0_36] : memref<64x32xbf16, #tpu.memory_space<vmem>>, vector<64x32xbf16>
    %cst_37 = arith.constant dense<0.000000e+00> : vector<8x32xf32>
    %103 = tpu.matmul %101, %102, %cst_37 {dimension_numbers = #tpu.dot_dimension_numbers<[1], [0], [0], [1], [0, 0, 1, 1], [], []>} : vector<8x64xbf16>, vector<64x32xbf16>, vector<8x32xf32> -> vector<8x32xf32>
    %c0_38 = arith.constant 0 : index
    %c0_39 = arith.constant 0 : index
    %104 = vector.load %arg9[%c0_38, %c0_39] : memref<1x32xf32, #tpu.memory_space<vmem>>, vector<1x32xf32>
    %105 = vector.broadcast %104 : vector<1x32xf32> to vector<8x32xf32>
    %106 = arith.addf %103, %105 : vector<8x32xf32>
    %107 = arith.addf %92, %106 : vector<8x32xf32>
    %cst_40 = arith.constant dense<0.000000e+00> : vector<8xf32>
    %108 = vector.multi_reduction <add>, %107, %cst_40 [1] : vector<8x32xf32> to vector<8xf32>
    %109 = vector.shape_cast %108 : vector<8xf32> to vector<8x1xf32>
    %cst_41 = arith.constant 3.200000e+01 : f32
    %110 = vector.broadcast %cst_41 : f32 to vector<8x1xf32>
    %111 = arith.divf %109, %110 : vector<8x1xf32>
    %112 = vector.broadcast %111 : vector<8x1xf32> to vector<8x32xf32>
    %113 = arith.subf %107, %112 : vector<8x32xf32>
    %114 = arith.mulf %113, %113 : vector<8x32xf32>
    %cst_42 = arith.constant dense<0.000000e+00> : vector<8xf32>
    %115 = vector.multi_reduction <add>, %114, %cst_42 [1] : vector<8x32xf32> to vector<8xf32>
    %116 = vector.shape_cast %115 : vector<8xf32> to vector<8x1xf32>
    %cst_43 = arith.constant 3.200000e+01 : f32
    %117 = vector.broadcast %cst_43 : f32 to vector<8x1xf32>
    %118 = arith.divf %116, %117 : vector<8x1xf32>
    %cst_44 = arith.constant 9.99999974E-6 : f32
    %119 = vector.broadcast %cst_44 : f32 to vector<8x1xf32>
    %120 = arith.addf %118, %119 : vector<8x1xf32>
    %121 = math.rsqrt %120 : vector<8x1xf32>
    %122 = vector.broadcast %121 : vector<8x1xf32> to vector<8x32xf32>
    %123 = arith.mulf %113, %122 : vector<8x32xf32>
    %c0_45 = arith.constant 0 : index
    %c0_46 = arith.constant 0 : index
    %124 = vector.load %arg12[%c0_45, %c0_46] : memref<1x32xf32, #tpu.memory_space<vmem>>, vector<1x32xf32>
    %125 = vector.broadcast %124 : vector<1x32xf32> to vector<8x32xf32>
    %126 = arith.mulf %123, %125 : vector<8x32xf32>
    %c0_47 = arith.constant 0 : index
    %c0_48 = arith.constant 0 : index
    %127 = vector.load %arg13[%c0_47, %c0_48] : memref<1x32xf32, #tpu.memory_space<vmem>>, vector<1x32xf32>
    %128 = vector.broadcast %127 : vector<1x32xf32> to vector<8x32xf32>
    %129 = arith.addf %126, %128 : vector<8x32xf32>
    %c0_49 = arith.constant 0 : index
    %c0_50 = arith.constant 0 : index
    %c0_51 = arith.constant 0 : index
    %130 = vector.load %arg14[%c0_49, %c0_50, %c0_51] : memref<1x8x32xf32, #tpu.memory_space<vmem>>, vector<1x8x32xf32>
    %131 = vector.shape_cast %130 : vector<1x8x32xf32> to vector<8x32xf32>
    %132 = vector.shape_cast %129 : vector<8x32xf32> to vector<1x8x32xf32>
    tpu.vector_store %arg14[%c0_49, %c0_50, %c0_51], %132 {strides = array<i32>} : memref<1x8x32xf32, #tpu.memory_space<vmem>>, vector<1x8x32xf32>,
    return
  }
  func.func @transform_0(%arg0: i32) -> (i32, i32, i32) {
    %c0_i32 = arith.constant 0 : i32
    %c0_i32_0 = arith.constant 0 : i32
    %c0_i32_1 = arith.constant 0 : i32
    return %arg0, %c0_i32, %c0_i32_0 : i32, i32, i32
  }
  func.func @transform_1(%arg0: i32) -> (i32, i32) {
    %c0_i32 = arith.constant 0 : i32
    %c0_i32_0 = arith.constant 0 : i32
    %c0_i32_1 = arith.constant 0 : i32
    return %c0_i32, %c0_i32_0 : i32, i32
  }
  func.func @transform_2(%arg0: i32) -> (i32, i32) {
    %c0_i32 = arith.constant 0 : i32
    %c0_i32_0 = arith.constant 0 : i32
    %c0_i32_1 = arith.constant 0 : i32
    return %c0_i32, %c0_i32_0 : i32, i32
  }
  func.func @transform_3(%arg0: i32) -> (i32, i32) {
    %c0_i32 = arith.constant 0 : i32
    %c0_i32_0 = arith.constant 0 : i32
    %c0_i32_1 = arith.constant 0 : i32
    return %c0_i32, %c0_i32_0 : i32, i32
  }
  func.func @transform_4(%arg0: i32) -> (i32, i32) {
    %c0_i32 = arith.constant 0 : i32
    %c0_i32_0 = arith.constant 0 : i32
    %c0_i32_1 = arith.constant 0 : i32
    return %c0_i32, %c0_i32_0 : i32, i32
  }
  func.func @transform_5(%arg0: i32) -> (i32, i32) {
    %c0_i32 = arith.constant 0 : i32
    %c0_i32_0 = arith.constant 0 : i32
    %c0_i32_1 = arith.constant 0 : i32
    return %c0_i32, %c0_i32_0 : i32, i32
  }
  func.func @transform_6(%arg0: i32) -> (i32, i32) {
    %c0_i32 = arith.constant 0 : i32
    %c0_i32_0 = arith.constant 0 : i32
    %c0_i32_1 = arith.constant 0 : i32
    return %c0_i32, %c0_i32_0 : i32, i32
  }
  func.func @transform_7(%arg0: i32) -> (i32, i32) {
    %c0_i32 = arith.constant 0 : i32
    %c0_i32_0 = arith.constant 0 : i32
    %c0_i32_1 = arith.constant 0 : i32
    return %c0_i32, %c0_i32_0 : i32, i32
  }
  func.func @transform_8(%arg0: i32) -> (i32, i32) {
    %c0_i32 = arith.constant 0 : i32
    %c0_i32_0 = arith.constant 0 : i32
    %c0_i32_1 = arith.constant 0 : i32
    return %c0_i32, %c0_i32_0 : i32, i32
  }
  func.func @transform_9(%arg0: i32) -> (i32, i32) {
    %c0_i32 = arith.constant 0 : i32
    %c0_i32_0 = arith.constant 0 : i32
    %c0_i32_1 = arith.constant 0 : i32
    return %c0_i32, %c0_i32_0 : i32, i32
  }
  func.func @transform_10(%arg0: i32) -> (i32, i32) {
    %c0_i32 = arith.constant 0 : i32
    %c0_i32_0 = arith.constant 0 : i32
    %c0_i32_1 = arith.constant 0 : i32
    return %c0_i32, %c0_i32_0 : i32, i32
  }
  func.func @transform_11(%arg0: i32) -> (i32, i32) {
    %c0_i32 = arith.constant 0 : i32
    %c0_i32_0 = arith.constant 0 : i32
    %c0_i32_1 = arith.constant 0 : i32
    return %c0_i32, %c0_i32_0 : i32, i32
  }
  func.func @transform_12(%arg0: i32) -> (i32, i32) {
    %c0_i32 = arith.constant 0 : i32
    %c0_i32_0 = arith.constant 0 : i32
    %c0_i32_1 = arith.constant 0 : i32
    return %c0_i32, %c0_i32_0 : i32, i32
  }
  func.func @transform_13(%arg0: i32) -> (i32, i32, i32) {
    %c0_i32 = arith.constant 0 : i32
    %c0_i32_0 = arith.constant 0 : i32
    %c0_i32_1 = arith.constant 0 : i32
    return %arg0, %c0_i32, %c0_i32_0 : i32, i32, i32
  }
  func.func @transform_14(%arg0: i32) -> (i32, i32, i32) {
    %c0_i32 = arith.constant 0 : i32
    %c0_i32_0 = arith.constant 0 : i32
    %c0_i32_1 = arith.constant 0 : i32
    return %arg0, %c0_i32, %c0_i32_0 : i32, i32, i32
  }
}

</mosaic_0001>

<bundles_post_ra>
// kernel: tpu_custom_call.1
= control target key start
LH: loop header
LB: loop body
LE: loop exit
PB: predicated region body
PF: predicated region fallthrough
CT: control target
= control target key end

     0   :  { %s1773_s0 = inlined_call_operand.vmem [shape: f32[2,8,32], index: 0, kind: input, shape index: {}]   ;;  %s1774_s1 = inlined_call_operand.vmem [shape: bf16[32,96], index: 1, kind: input, shape index: {}]   ;;  %s1775_s2 = inlined_call_operand.vmem [shape: f32[1,96], index: 2, kind: input, shape index: {}]   ;;  %s1776_s3 = inlined_call_operand.vmem [shape: bf16[32,32], index: 3, kind: input, shape index: {}]   ;;  %s1777_s4 = inlined_call_operand.vmem [shape: f32[1,32], index: 4, kind: input, shape index: {}]   ;;  %s1778_s5 = inlined_call_operand.hbm [shape: bf16[32,64], index: 5, kind: input, shape index: {}]   ;;  %s1779_s6 = inlined_call_operand.vmem [shape: f32[1,64], index: 6, kind: input, shape index: {}]   ;;  %s1780_s7 = inlined_call_operand.vmem [shape: bf16[64,32], index: 7, kind: input, shape index: {}]   ;;  %s1781_s8 = inlined_call_operand.vmem [shape: f32[1,32], index: 8, kind: input, shape index: {}]   ;;  %s1782_s9 = inlined_call_operand.vmem [shape: f32[1,32], index: 9, kind: input, shape index: {}]   ;;  %s1783_s10 = inlined_call_operand.vmem [shape: f32[1,32], index: 10, kind: input, shape index: {}]   ;;  %s1784_s11 = inlined_call_operand.vmem [shape: f32[1,32], index: 11, kind: input, shape index: {}]   ;;  %s1785_s12 = inlined_call_operand.vmem [shape: f32[1,32], index: 12, kind: input, shape index: {}]   ;;  %s1786_s13 = inlined_call_operand.hbm [shape: f32[2,8,32], index: 13, kind: output, shape index: {0}]   ;;  %s1787_s14 = inlined_call_operand.hbm [shape: f32[2,8,8], index: 14, kind: output, shape index: {1}]  }
   0x1   :  { %1792 = sst [smem:[#allocation14_spill]] %s1773_s0 }
   0x2   :  { %1793 = sst [smem:[#allocation15_spill]] %s1774_s1 }
   0x3   :  { %1794 = sst [smem:[#allocation16_spill]] %s1775_s2 }
   0x4   :  { %1795 = sst [smem:[#allocation17_spill]] %s1776_s3 }
   0x5   :  { %1796 = sst [smem:[#allocation18_spill]] %s1777_s4 }
   0x6   :  { %1797 = sst [smem:[#allocation19_spill]] %s1778_s5 }
   0x7   :  { %20 = vsyncpa [#allocation3], 0 }
   0x8   :  { %21 = vsyncpa [#allocation4], 0 }
   0x9   :  { %23 = vsyncpa [#allocation4 + $0x1], 0 }
   0xa   :  { %24 = vsyncpa [#allocation7], 0 }
   0xb   :  { %26 = vsyncpa [#allocation7 + $0x1], 0  ;;  %s1543_s29 = smov 0   ;;  %s1545_s30 = smov 0  }
   0xc   :  { %s1547_s15 = smov 0   ;;  %s1549_s16 = smov 0  }
   0xd LB: > { %1798 = sst [smem:[#allocation11_spill]] %s1449_s15  ;;  %s1564_s17 = sadd.s32 4294967295, %s1453_s16   ;;  %s1453_s16 = sphi %s1549_s16, %s1810_s16   ;;  %s1449_s15 = sphi %s1547_s15, %s1812_s15   ;;  %s1445_s30 = sphi %s1545_s30, %s1814_s30   ;;  %s1441_s29 = sphi %s1543_s29, %s1813_s29  }
   0xe   : > { %s1149_s18 = sadd.s32 4294967294, %s1453_s16   ;;  %s1568_s19 = sadd.s32 1, %s1453_s16  }
   0xf   : > { %1799 = sst [smem:[#allocation12_spill]] %s1568_s19  ;;  %s317_s20 = sadd.s32 1, %s1449_s15 }
  0x10   : > { %s314_s21 = ssub.s32 %s1453_s16, %s1568_s19  ;;  %p327_p0 = scmp.ne.s32.totalorder %s1449_s15, %s1445_s30 }
  0x11   : > { %p315_p1 = scmp.eq.s32.totalorder %s314_s21, 0  ;;  %p328_p2 = scmp.eq.s32.totalorder %s1564_s17, 1 }
  0x12   : > { %p333_p3 = scmp.ne.s32.totalorder %s1445_s30, %s1441_s29  ;;  %p334_p4 = scmp.eq.s32.totalorder %s1149_s18, 1 }
  0x13   : > { %s1579_s22 = scalar_select %p315_p1, %s1449_s15, %s317_s20  }
  0x14   : > { %p1581_p5 = por %p328_p2, %p327_p0  ;;  %p1585_p6 = por %p334_p4, %p333_p3 }
  0x15   : > { %1800 = sst [smem:[#allocation13_spill]] %s1579_s22  ;;  %p1150_p7 = scmp.ge.s32.totalorder %s1453_s16, 1 }
  0x16   : > { %p367_p8 = scmp.lt.s32.totalorder %s1453_s16, 3  ;;  %p1245_p9 = scmp.eq.s32.totalorder %s1564_s17, 0 }
  0x17   : > { %s1803_s5 = sld [smem:[#allocation19_spill]]  ;;  %s1455_s28 = smov [#allocation2]  }
  0x18   : > { %p368_p10 = pnand %p1150_p7, %p367_p8  ;;  %s392_s18 = sshll.u32 %s1455_s28, 4  ;;  %s393_s18 = int_to_ptr.vmem [resolvable:$true] %s392_s18 }
  0x19   : > { %s1456_s20 = smov 64   ;;  %s1457_s21 = smov 4  }
  0x1a   : > { %p1234_p11 = pneg %p368_p10  ;;  %436 = sbr.rel (%p368_p10) target bundleno = 2007 (0x7d7), region = 72 }
  0x1c   : > { %p1235_p12 = pnand %p1245_p9, %p1234_p11 }
  0x1d   : > { %s390_s27 = sshll.u32 %s1803_s5, 4  ;;  %s391_s27 = int_to_ptr.hbm [resolvable:$true] %s390_s27 }
  0x1e   : > { %1237 = dma.hbm_to_vmem [thread:$0]  (!%p1235_p12), %s391_s27, 256, %s393_s18, [#allocation3], %s1456_s20, %s1456_s20, %s1457_s21  }
  0x1f   : > { %1428 = dma.done.wait (%p1245_p9), [#allocation3], 256  }
  0x20   : > { %1430 = vsyncadd (%p1245_p9), [#allocation3], 4294967040  ;;  %p487_p13 = scmp.lt.s32.totalorder %s1564_s17, 1  ;;  %s1804_s0 = sld [smem:[#allocation14_spill]]  ;;  %vm514_vm0 = vcmask 261120   ;;  %vm543_vm1 = vcmask 64512  }
  0x21   : > { %s1805_s1 = sld [smem:[#allocation15_spill]]  ;;  %s1458_s15 = smov 104   ;;  %vm701_vm2 = vcmask 1043456   ;;  %vm803_vm4 = vcmask 130048   ;;  %vm806_vm5 = vcmask 195584   ;;  %vm959_vm10 = vcmask 523264  }
  0x22   : > { %s488_s25 = scalar_select %p487_p13, %s1564_s17, 1 }
  0x23   : > { %s1806_s2 = sld [smem:[#allocation16_spill]]  ;;  %s1459_s19 = smov 120  }
  0x24   : > { %s1157_s26 = sshll.u32 %s488_s25, 3  ;;  %s1461_s21 = smov 96  }
  0x25   : > { %s1462_s25 = smov 64   ;;  %s1464_s18 = smov 16  }
  0x26   : > { %s490_s22 = scalar_lea.vmem %s1804_s0, %s1157_s26  ;;  %s1654_s26 = sand.u32 1, %s1445_s30  }
  0x27   : > { %v1217_v0 = vld [vmem:[%s1805_s1 + $0x8] sm:$0xff]  ;;  %v1216_v1 = vld [vmem:[%s1805_s1] sm:$0xff]  ;;  %s1791_s28 = sshll.u32 %s1654_s26, 3  ;;  %s1465_s5 = smov 8  }
  0x28   : > { %v1612_v2 = vld [vmem:[%s490_s22] sm:$0xff]  ;;  %524 = vmatpush.bf16.msra.mxu0 %v1217_v0  ;;  %s1460_s22 = smov 112   ;;  %s1662_s27 = scalar_lea.vmem [#allocation6], %s1791_s28 }
  0x29   : > { %v493_v3 = vpack.c.bf16 %v1612_v2, %v1612_v2  ;;  %v1293_v4 = vld [vmem:[%s1806_s2] ss:$0 sm:$0xff]  ;;  %s1466_s20 = smov 24   ;;  %s1807_s3 = sld [smem:[#allocation17_spill]] }
  0x2a   : > { %s1808_s4 = sld [smem:[#allocation18_spill]]  ;;  %s1375_s2 = scalar_lea.hbm %s1787_s14, 16 }
  0x2c   : > { %525 = vmatpush.bf16.msra.mxu0 %v1216_v1 }
  0x2f   : > { %1166 = vmatmul.msk.bf16.vlgmr.msra.gmra.mxu0 %vm514_vm0, %v493_v3 }
  0xac   : > { %v527_v5 = vpop.f32.mrf.mxu0 }
  0xad   : > { %v528_v6 = vadd.f32 %v1293_v4, %v527_v5 }
  0xaf   : > { %v531_v7 = vpack.c.bf16 %v528_v6, %v528_v6 }
  0xb1   : > { %537 = vrot.lane.b32.xlu1 %v531_v7, %s1458_s15  ;;  %533 = vrot.lane.b32.xlu0 %v531_v7, %s1459_s19  ;;  %v539_v9 = vunpack.c.l.b16 %v531_v7 }
  0xb3   : > { %v1620_v10 = vpack.c.b16 %v539_v9, %v539_v9 }
  0xb4   : > { %v529_v8 = vpop.f32.mrf.mxu0 }
  0xb9   : > { %535 = vrot.lane.b32.xlu0 %v531_v7, %s1460_s22  ;;  %s1042_s22 = sshll.u32 %s1662_s27, 4  ;;  %s1043_s22 = int_to_ptr.vmem [resolvable:$true] %s1042_s22 }
  0xc1   : > { %541 = vrot.lane.b32.xlu0 %v1620_v10, %s1461_s21 }
 0x123   : > { %v534_v11 = vpop.permute.xlu0 %533  ;;  %v538_v17 = vpop.permute.xlu1 %537 }
 0x124   : > { %v563_v12 = vunpack.c.l.b16 %v534_v11  ;;  %v609_v18 = vunpack.c.l.b16 %v538_v17 }
 0x126   : > { %v1623_v13 = vpack.c.b16 %v563_v12, %v563_v12  ;;  %v610_v21 = vpack.c.b16 %v609_v18, %v609_v18 }
 0x128   : > { %565 = vrot.lane.b32.xlu1 %v1623_v13, %s1461_s21 }
 0x12b   : > { %v536_v14 = vpop.permute.xlu0 %535 }
 0x12c   : > { %v586_v15 = vunpack.c.l.b16 %v536_v14 }
 0x12e   : > { %v587_v16 = vpack.c.b16 %v586_v15, %v586_v15 }
 0x130   : > { %588 = vrot.lane.b32.xlu2 %v587_v16, %s1461_s21 }
 0x133   : > { %v542_v19 = vpop.permute.xlu0 %541 }
 0x134   : > { %v548_v20 = vsel %vm543_vm1, %v542_v19, 0 }
 0x135   : > { %557 = vmatpush.bf16.xpose.msra.mxu1 %v548_v20 }
 0x138   : > { %611 = vrot.lane.b32.xlu2 %v610_v21, %s1461_s21 }
 0x13c   : > { %1167 = vmatmul.msk.bf16.vlgmr.msra.gmra.mxu1 %vm543_vm1, %v531_v7 }
 0x18a   : > { %v589_v22 = vpop.permute.xlu2 %588 }
 0x18b   : > { %v594_v23 = vsel %vm543_vm1, %v589_v22, 0 }
 0x18c   : > { %603 = vmatpush.bf16.xpose.msra.mxu3 %v594_v23 }
 0x192   : > { %v612_v24 = vpop.permute.xlu2 %611 }
 0x193   : > { %1169 = vmatmul.msk.bf16.vlgmr.msra.gmra.mxu3 %vm543_vm1, %v536_v14  ;;  %v617_v25 = vsel %vm543_vm1, %v612_v24, 0 }
 0x194   : > { %626 = vmatpush.bf16.xpose.msrb.mxu0 %v617_v25 }
 0x19a   : > { %v566_v26 = vpop.permute.xlu1 %565 }
 0x19b   : > { %1170 = vmatmul.msk.bf16.vlgmr.msrb.gmra.mxu0 %vm543_vm1, %v538_v17  ;;  %v571_v27 = vsel %vm543_vm1, %v566_v26, 0  ;;  %v1463_v17 = vmov 4.0  }
 0x19c   : > { %580 = vmatpush.bf16.xpose.msra.mxu2 %v571_v27 }
 0x1a3   : > { %1168 = vmatmul.msk.bf16.vlgmr.msra.gmra.mxu2 %vm543_vm1, %v534_v11 }
 0x1b9   : > { %v559_v28 = vpop.f32.mrf.mxu1 }
 0x1ba   : > { %v632_v35 = vsel %vm543_vm1, %v559_v28, -inf }
 0x1c1   : > { %v561_v29 = vpop.f32.mrf.mxu1 }
 0x216   : > { %v605_v30 = vpop.f32.mrf.mxu3 }
 0x217   : > { %v638_v31 = vsel %vm543_vm1, %v605_v30, -inf }
 0x218   : > { %639 = vmax.xlane.f32.xlu2 %v638_v31  ;;  %v628_v32 = vpop.f32.mrf.mxu0 }
 0x219   : > { %v641_v33 = vsel %vm543_vm1, %v628_v32, -inf }
 0x21a   : > { %642 = vmax.xlane.f32.xlu0 %v641_v33 }
 0x21e   : > { %v607_v34 = vpop.f32.mrf.mxu3 }
 0x220   : > { %v630_v36 = vpop.f32.mrf.mxu0  ;;  %633 = vmax.xlane.f32.xlu2 %v632_v35 }
 0x226   : > { %v582_v37 = vpop.f32.mrf.mxu2 }
 0x227   : > { %v635_v38 = vsel %vm543_vm1, %v582_v37, -inf }
 0x228   : > { %636 = vmax.xlane.f32.xlu1 %v635_v38 }
 0x22e   : > { %v584_v39 = vpop.f32.mrf.mxu2 }
 0x28b   : > { %v640_v40 = vpop.xlane.xlu2 %639 }
 0x28c   : > { %v646_v41 = vsub.f32 %v605_v30, %v640_v40 }
 0x28d   : > { %v643_v42 = vpop.xlane.xlu0 %642 }
 0x28e   : > { %v652_v43 = vmul.f32 1.442695, %v646_v41  ;;  %v647_v44 = vsub.f32 %v628_v32, %v643_v42 }
 0x290   : > { %1301 = vpow2.f32 %v652_v43  ;;  %v654_v45 = vmul.f32 1.442695, %v647_v44 }
 0x292   : > { %1303 = vpow2.f32 %v654_v45 }
 0x293   : > { %v634_v55 = vpop.xlane.xlu2 %633 }
 0x294   : > { %v644_v56 = vsub.f32 %v559_v28, %v634_v55 }
 0x296   : > { %v1302_v46 = vpop.eup %1301  ;;  %v648_v57 = vmul.f32 1.442695, %v644_v56 }
 0x297   : > { %v662_v47 = vsel %vm543_vm1, %v1302_v46, 0.0 }
 0x298   : > { %v1304_v48 = vpop.eup %1303  ;;  %663 = vadd.xlane.f32.xlu2 %v662_v47 }
 0x299   : > { %v665_v49 = vsel %vm543_vm1, %v1304_v48, 0.0 }
 0x29a   : > { %666 = vadd.xlane.f32.xlu0 %v665_v49 }
 0x29b   : > { %v637_v50 = vpop.xlane.xlu1 %636 }
 0x29c   : > { %v645_v51 = vsub.f32 %v582_v37, %v637_v50 }
 0x29e   : > { %v650_v52 = vmul.f32 1.442695, %v645_v51 }
 0x2a0   : > { %1305 = vpow2.f32 %v650_v52 }
 0x2a1   : > { %1307 = vpow2.f32 %v648_v57 }
 0x2a6   : > { %v1306_v53 = vpop.eup %1305 }
 0x2a7   : > { %v659_v54 = vsel %vm543_vm1, %v1306_v53, 0.0  ;;  %v1308_v58 = vpop.eup %1307 }
 0x2a8   : > { %660 = vadd.xlane.f32.xlu1 %v659_v54  ;;  %v656_v59 = vsel %vm543_vm1, %v1308_v58, 0.0  ;;  %v1218_v54 = vld [vmem:[%s1807_s3] sm:$0xff] }
 0x2ae   : > { %760 = vrot.lane.b32.xlu0 %v610_v21, %s1462_s25 }
 0x2b0   : > { %739 = vrot.lane.b32.xlu2 %v587_v16, %s1462_s25 }
 0x2b6   : > { %696 = vrot.lane.b32.xlu0 %v1620_v10, %s1462_s25 }
 0x2c1   : > { %718 = vrot.lane.b32.xlu1 %v1623_v13, %s1462_s25  ;;  %s1016_s25 = scalar_lea.sflag [#allocation7], %s1654_s26 }
 0x2eb   : > { %657 = vadd.xlane.f32.xlu1 %v656_v59 }
 0x30b   : > { %v664_v60 = vpop.xlane.xlu2 %663 }
 0x30c   : > { %1309 = vrcp.f32 %v664_v60 }
 0x30d   : > { %v667_v63 = vpop.xlane.xlu0 %666 }
 0x30e   : > { %1311 = vrcp.f32 %v667_v63 }
 0x312   : > { %v1310_v61 = vpop.eup %1309 }
 0x313   : > { %v674_v62 = vmul.f32 %v1310_v61, %v1302_v46  ;;  %v740_v0 = vpop.permute.xlu2 %739 }
 0x314   : > { %v745_v1 = vsel %vm701_vm2, %v740_v0, 0  ;;  %v1312_v4 = vpop.eup %1311 }
 0x315   : > { %754 = vmatpush.bf16.msrb.mxu3 %v745_v1  ;;  %v694_v3 = vpack.c.bf16 %v674_v62, %v674_v62  ;;  %v675_v5 = vmul.f32 %v1312_v4, %v1304_v48  ;;  %v679_v30 = vsel %vm543_vm1, %v674_v62, 0.0  ;;  %v1294_v62 = vld [vmem:[%s1808_s4] ss:$0 sm:$0xff] }
 0x317   : > { %v695_v8 = vpack.c.bf16 %v675_v5, %v675_v5  ;;  %v681_v32 = vsel %vm543_vm1, %v675_v5, 0.0  ;;  %v1467_v5 = vmov 32.0  }
 0x318   : > { %1173 = vmatmul.msk.bf16.vlgmr.msrb.gmra.mxu3 %vm543_vm1, %v694_v3 }
 0x31b   : > { %v661_v9 = vpop.xlane.xlu1 %660 }
 0x31c   : > { %1313 = vrcp.f32 %v661_v9 }
 0x31d   : > { %1315 = vrcp.f32 %v1463_v17  ;;  %v1220_v17 = vld [vmem:[#allocation2] sm:$0xff] }
 0x320   : > { %v761_v6 = vpop.permute.xlu0 %760 }
 0x321   : > { %v766_v7 = vsel %vm701_vm2, %v761_v6, 0 }
 0x322   : > { %775 = vmatpush.bf16.msra.mxu0 %v766_v7  ;;  %v1314_v12 = vpop.eup %1313 }
 0x323   : > { %v673_v13 = vmul.f32 %v1314_v12, %v1306_v53  ;;  %v1316_v18 = vpop.eup %1315  ;;  %v1219_v53 = vld [vmem:[%s1807_s3 + $0x8] sm:$0xff] }
 0x324   : > { %v684_v19 = vmul.f32 4.0, %v1316_v18  ;;  %vm688_vm3 = vweird.f32 %v1316_v18 }
 0x325   : > { %1174 = vmatmul.msk.bf16.vlgmr.msra.gmra.mxu0 %vm543_vm1, %v695_v8  ;;  %v693_v16 = vpack.c.bf16 %v673_v13, %v673_v13  ;;  %v677_v25 = vsel %vm543_vm1, %v673_v13, 0.0 }
 0x326   : > { %v685_v21 = vsub.f32 1.0, %v684_v19 }
 0x328   : > { %v697_v10 = vpop.permute.xlu0 %696  ;;  %v686_v22 = vmul.f32 %v1316_v18, %v685_v21  ;;  %v1224_v21 = vld [vmem:[%s1780_s7 + $0x10] sm:$0xff] }
 0x329   : > { %v703_v11 = vsel %vm701_vm2, %v697_v10, 0 }
 0x32a   : > { %712 = vmatpush.bf16.msrb.mxu1 %v703_v11  ;;  %v687_v28 = vadd.f32 %v1316_v18, %v686_v22 }
 0x32c   : > { %v689_v33 = vsel %vm688_vm3, %v1316_v18, %v687_v28  ;;  %v1225_v18 = vld [vmem:[%s1780_s7 + $0x18] sm:$0xff] }
 0x32d   : > { %967 = vmatpush.bf16.msra.mxu3 %v1225_v18 }
 0x32e   : > { %837 = vmatpush.bf16.msra.mxu1 %v1219_v53 }
 0x331   : > { %968 = vmatpush.bf16.msra.mxu3 %v1224_v21 }
 0x332   : > { %838 = vmatpush.bf16.msra.mxu1 %v1218_v54 }
 0x333   : > { %v719_v14 = vpop.permute.xlu1 %718 }
 0x334   : > { %v724_v15 = vsel %vm701_vm2, %v719_v14, 0 }
 0x335   : > { %733 = vmatpush.bf16.msrb.mxu2 %v724_v15 }
 0x338   : > { %1172 = vmatmul.msk.bf16.vlgmr.msrb.gmra.mxu2 %vm543_vm1, %v693_v16  ;;  %v1221_v16 = vld [vmem:[#allocation2 + $0x8] sm:$0xff] }
 0x339   : > { %914 = vmatpush.bf16.msra.mxu2 %v1221_v16 }
 0x33d   : > { %915 = vmatpush.bf16.msra.mxu2 %v1220_v17 }
 0x35e   : > { %v658_v20 = vpop.xlane.xlu1 %657 }
 0x35f   : > { %1317 = vrcp.f32 %v658_v20 }
 0x360   : > { %1319 = vrcp.f32 %v1467_v5 }
 0x365   : > { %v1318_v23 = vpop.eup %1317 }
 0x366   : > { %v672_v24 = vmul.f32 %v1318_v23, %v1308_v58  ;;  %v1320_v6 = vpop.eup %1319 }
 0x367   : > { %v849_v7 = vmul.f32 32.0, %v1320_v6  ;;  %vm853_vm6 = vweird.f32 %v1320_v6 }
 0x368   : > { %v676_v26 = vsel %vm543_vm1, %v672_v24, 0.0  ;;  %v692_v27 = vpack.c.bf16 %v672_v24, %v672_v24 }
 0x369   : > { %v678_v29 = vadd.f32 %v677_v25, %v676_v26  ;;  %v850_v8 = vsub.f32 1.0, %v849_v7 }
 0x36a   : > { %1171 = vmatmul.msk.bf16.vlgmr.msrb.gmra.mxu1 %vm543_vm1, %v692_v27 }
 0x36b   : > { %v680_v31 = vadd.f32 %v679_v30, %v678_v29  ;;  %v851_v9 = vmul.f32 %v1320_v6, %v850_v8  ;;  %v1295_v29 = vld [vmem:[%s1782_s9] ss:$0 sm:$0xff] }
 0x36d   : > { %v682_v34 = vadd.f32 %v681_v32, %v680_v31  ;;  %v852_v10 = vadd.f32 %v1320_v6, %v851_v9  ;;  %v1296_v31 = vld [vmem:[%s1783_s10] ss:$0 sm:$0xff] }
 0x36f   : > { %v690_v35 = vmul.f32 %v689_v33, %v682_v34  ;;  %v1679_v11 = vsel %vm853_vm6, %v1320_v6, %v852_v10 }
 0x371   : > { %691 = vst.msk [vmem:[%s1662_s27] sm:$0xff] %vm543_vm1, %v690_v35 }
 0x39b   : > { %v756_v36 = vpop.f32.mrf.mxu3 }
 0x39c   : > { %v783_v37 = vpack.c.bf16 %v756_v36, %v756_v36  ;;  %v1223_v36 = vld [vmem:[%s1780_s7 + $0x8] sm:$0xff] }
 0x39d   : > { %969 = vmatpush.bf16.msra.mxu3 %v1223_v36 }
 0x39e   : > { %v791_v38 = vunpack.c.l.b16 %v783_v37  ;;  %v1222_v37 = vld [vmem:[%s1780_s7] sm:$0xff] }
 0x3a0   : > { %v792_v39 = vpack.c.b16 %v791_v38, %v791_v38  ;;  %v1297_v38 = vld [vmem:[%s1779_s6] ss:$0 sm:$0xff] }
 0x3a1   : > { %970 = vmatpush.bf16.msra.mxu3 %v1222_v37 }
 0x3a2   : > { %793 = vrot.lane.b32.xlu0 %v792_v39, %s1464_s18  ;;  %v777_v40 = vpop.f32.mrf.mxu0 }
 0x3a3   : > { %v758_v41 = vpop.f32.mrf.mxu3  ;;  %v784_v46 = vpack.c.bf16 %v777_v40, %v777_v40 }
 0x3a5   : > { %v796_v49 = vunpack.c.l.b16 %v784_v46 }
 0x3a7   : > { %v797_v50 = vpack.c.b16 %v796_v49, %v796_v49 }
 0x3aa   : > { %v779_v42 = vpop.f32.mrf.mxu0 }
 0x3bb   : > { %v735_v43 = vpop.f32.mrf.mxu2 }
 0x3bc   : > { %v782_v44 = vpack.c.bf16 %v735_v43, %v735_v43 }
 0x3be   : > { %v786_v45 = vunpack.c.l.b16 %v782_v44  ;;  %v1298_v44 = vld [vmem:[%s1781_s8] ss:$0 sm:$0xff] }
 0x3c0   : > { %v787_v47 = vpack.c.b16 %v786_v45, %v786_v45 }
 0x3c2   : > { %788 = vrot.lane.b32.xlu2 %v787_v47, %s1465_s5  ;;  %s1212_s5 = sshll.u32 %s1564_s17, 3 }
 0x3c3   : > { %v737_v48 = vpop.f32.mrf.mxu2  ;;  %s1040_s19 = scalar_lea.hbm %s1787_s14, %s1212_s5 }
 0x3c4   : > { %s1044_s21 = sshll.u32 %s1040_s19, 4  ;;  %s1045_s21 = int_to_ptr.hbm [resolvable:$true] %s1044_s21 }
 0x3c5   : > { %s1369_s18 = sshra.s32 %s1045_s21, 4  ;;  %s1370_s18 = int_to_ptr.hbm [resolvable:$true] %s1369_s18 }
 0x3c6   : > { %s1371_s28 = scalar_lea.hbm %s1370_s18, 8  ;;  %p1376_p3 = scmp.lt.s32.totalorder %s1370_s18, %s1787_s14 }
 0x3c7   : > { %p1372_p0 = scmp.ne.s32.totalorder %s1370_s18, %s1371_s28  ;;  %p1377_p4 = scmp.lt.s32.totalorder %s1375_s2, %s1371_s28 }
 0x3c9   : > { %p1373_p1 = pnand %p1372_p0, %p1581_p5  ;;  %p1378_p7 = por %p1377_p4, %p1376_p3 }
 0x3ca   : > { %798 = vrot.lane.b32.xlu2 %v797_v50, %s1466_s20 }
 0x3cb   : > { %p1374_p2 = pneg %p1373_p1 }
 0x3cd   : > { %p1379_p8 = pnand %p1378_p7, %p1374_p2 }
 0x3e7   : > { %v714_v51 = vpop.f32.mrf.mxu1 }
 0x3e8   : > { %v781_v56 = vpack.c.bf16 %v714_v51, %v714_v51 }
 0x3ef   : > { %v716_v52 = vpop.f32.mrf.mxu1 }
 0x414   : > { %v794_v58 = vpop.permute.xlu0 %793 }
 0x41c   : > { %v789_v55 = vpop.permute.xlu2 %788 }
 0x41d   : > { %v802_v57 = vsel %vm543_vm1, %v781_v56, %v789_v55 }
 0x41e   : > { %v805_v60 = vsel %vm803_vm4, %v802_v57, %v794_v58 }
 0x424   : > { %v799_v59 = vpop.permute.xlu2 %798 }
 0x425   : > { %v808_v61 = vsel %vm806_vm5, %v805_v60, %v799_v59 }
 0x426   : > { %1183 = vmatmul.msk.bf16.vlgmr.msra.gmra.mxu1 %vm514_vm0, %v808_v61 }
 0x4a3   : > { %v840_v63 = vpop.f32.mrf.mxu1 }
 0x4a4   : > { %v841_v0 = vadd.f32 %v1294_v62, %v840_v63 }
 0x4a6   : > { %v844_v1 = vadd.f32 %v841_v0, %v1612_v2 }
 0x4a8   : > { %v845_v3 = vsel %vm514_vm0, %v844_v1, 0.0 }
 0x4a9   : > { %846 = vadd.xlane.f32.xlu0 %v845_v3 }
 0x4ab   : > { %v842_v4 = vpop.f32.mrf.mxu1 }
 0x51c   : > { %v847_v12 = vpop.xlane.xlu0 %846 }
 0x51d   : > { %v855_v13 = vmul.f32 %v1679_v11, %v847_v12 }
 0x51f   : > { %v856_v14 = vsub.f32 %v844_v1, %v855_v13 }
 0x521   : > { %v857_v15 = vmul.f32 %v856_v14, %v856_v14 }
 0x523   : > { %v858_v2 = vsel %vm514_vm0, %v857_v15, 0.0 }
 0x524   : > { %859 = vadd.xlane.f32.xlu2 %v858_v2 }
 0x597   : > { %v860_v19 = vpop.xlane.xlu2 %859 }
 0x598   : > { %v861_v20 = vmul.f32 %v860_v19, %v1679_v11 }
 0x59a   : > { %v862_v22 = vadd.f32 1e-05, %v861_v20 }
 0x59c   : > { %1321 = vrsqrt.f32 %v862_v22  ;;  %vm869_vm8 = vweird.f32 %v862_v22 }
 0x5a2   : > { %v1322_v23 = vpop.eup %1321 }
 0x5a3   : > { %v864_v24 = vmul.f32 %v1322_v23, %v862_v22  ;;  %vm870_vm7 = vweird.f32 %v1322_v23 }
 0x5a4   : > { %vm871_vm9 = vmor %vm869_vm8, %vm870_vm7 }
 0x5a5   : > { %v865_v25 = vmul.f32 %v1322_v23, %v864_v24 }
 0x5a7   : > { %v866_v26 = vmul.f32 0.5, %v865_v25 }
 0x5a9   : > { %v867_v27 = vsub.f32 1.5, %v866_v26 }
 0x5ab   : > { %v868_v28 = vmul.f32 %v1322_v23, %v867_v27 }
 0x5ad   : > { %v872_v30 = vsel %vm871_vm9, %v1322_v23, %v868_v28 }
 0x5ae   : > { %v873_v32 = vmul.f32 %v872_v30, %v856_v14 }
 0x5b0   : > { %v878_v33 = vmul.f32 %v1295_v29, %v873_v32 }
 0x5b2   : > { %v883_v34 = vadd.f32 %v1296_v31, %v878_v33 }
 0x5b4   : > { %v884_v35 = vpack.c.bf16 %v883_v34, %v883_v34 }
 0x5b6   : > { %1192 = vmatmul.msk.bf16.vlgmr.msra.gmra.mxu2 %vm514_vm0, %v884_v35 }
 0x639   : > { %v917_v39 = vpop.f32.mrf.mxu2 }
 0x63a   : > { %v918_v40 = vadd.f32 %v1297_v38, %v917_v39 }
 0x63c   : > { %v921_v41 = vmax.f32 %v918_v40, 0.0 }
 0x63e   : > { %v922_v42 = vpack.c.bf16 %v921_v41, %v921_v41 }
 0x640   : > { %1209 = vmatmul.msk.bf16.vlgmr.msra.gmra.mxu3 %vm959_vm10, %v922_v42 }
 0x641   : > { %v919_v43 = vpop.f32.mrf.mxu2 }
 0x6c3   : > { %v972_v45 = vpop.f32.mrf.mxu3 }
 0x6c4   : > { %v973_v46 = vadd.f32 %v1298_v44, %v972_v45 }
 0x6c6   : > { %v976_v47 = vadd.f32 %v973_v46, %v883_v34 }
 0x6c8   : > { %v977_v48 = vsel %vm514_vm0, %v976_v47, 0.0 }
 0x6c9   : > { %978 = vadd.xlane.f32.xlu1 %v977_v48 }
 0x6cb   : > { %v974_v49 = vpop.f32.mrf.mxu3 }
 0x73c   : > { %v979_v50 = vpop.xlane.xlu1 %978 }
 0x73d   : > { %v980_v51 = vmul.f32 %v979_v50, %v1679_v11 }
 0x73f   : > { %v981_v52 = vsub.f32 %v976_v47, %v980_v51 }
 0x741   : > { %v982_v53 = vmul.f32 %v981_v52, %v981_v52 }
 0x743   : > { %v983_v54 = vsel %vm514_vm0, %v982_v53, 0.0 }
 0x744   : > { %984 = vadd.xlane.f32.xlu1 %v983_v54 }
 0x745   : > { %1382 = shalt.err (!%p1379_p8)
}
 0x746   : > { %1231 = dma.vmem_to_hbm [thread:$0]  (%p1581_p5), %s1043_s22, 128, %s1045_s21, %s1016_s25   ;;  %v1299_v0 = vld [vmem:[%s1784_s11] ss:$0 sm:$0xff] }
 0x747   : > { %s1026_s4 = scalar_lea.hbm %s1786_s13, %s1212_s5  ;;  %v1300_v4 = vld [vmem:[%s1785_s12] ss:$0 sm:$0xff]  ;;  %s1809_s20 = sshll.u32 %s1654_s26, 3 }
 0x748   : > { %s479_s15 = scalar_lea.vmem [#allocation5], %s1809_s20  ;;  %s1030_s22 = sshll.u32 %s1026_s4, 4  ;;  %s1031_s22 = int_to_ptr.hbm [resolvable:$true] %s1030_s22 }
 0x749   : > { %s1028_s19 = sshll.u32 %s479_s15, 4  ;;  %s1011_s17 = scalar_lea.sflag [#allocation4], %s1654_s26  ;;  %s1029_s19 = int_to_ptr.vmem [resolvable:$true] %s1028_s19 }
 0x74a   : > { %s1397_s21 = sshra.s32 %s1031_s22, 4  ;;  %s1403_s0 = scalar_lea.hbm %s1786_s13, 16  ;;  %s1398_s21 = int_to_ptr.hbm [resolvable:$true] %s1397_s21 }
 0x74b   : > { %s1399_s5 = scalar_lea.hbm %s1398_s21, 8  ;;  %p1404_p12 = scmp.lt.s32.totalorder %s1398_s21, %s1786_s13 }
 0x74c   : > { %p1400_p9 = scmp.ne.s32.totalorder %s1398_s21, %s1399_s5  ;;  %p1405_p13 = scmp.lt.s32.totalorder %s1403_s0, %s1399_s5 }
 0x74e   : > { %p1401_p10 = pnand %p1400_p9, %p1581_p5  ;;  %p1406_p0 = por %p1405_p13, %p1404_p12 }
 0x750   : > { %p1402_p11 = pneg %p1401_p10 }
 0x752   : > { %p1407_p1 = pnand %p1406_p0, %p1402_p11 }
 0x7b7   : > { %v985_v55 = vpop.xlane.xlu1 %984 }
 0x7b8   : > { %v986_v56 = vmul.f32 %v985_v55, %v1679_v11 }
 0x7ba   : > { %v987_v57 = vadd.f32 1e-05, %v986_v56 }
 0x7bc   : > { %1323 = vrsqrt.f32 %v987_v57  ;;  %vm994_vm12 = vweird.f32 %v987_v57 }
 0x7c2   : > { %v1324_v58 = vpop.eup %1323 }
 0x7c3   : > { %v989_v59 = vmul.f32 %v1324_v58, %v987_v57  ;;  %vm995_vm11 = vweird.f32 %v1324_v58 }
 0x7c4   : > { %vm996_vm13 = vmor %vm994_vm12, %vm995_vm11 }
 0x7c5   : > { %v990_v60 = vmul.f32 %v1324_v58, %v989_v59 }
 0x7c7   : > { %v991_v61 = vmul.f32 0.5, %v990_v60 }
 0x7c9   : > { %v992_v62 = vsub.f32 1.5, %v991_v61 }
 0x7cb   : > { %v993_v63 = vmul.f32 %v1324_v58, %v992_v62 }
 0x7cd   : > { %v997_v1 = vsel %vm996_vm13, %v1324_v58, %v993_v63 }
 0x7ce   : > { %v998_v3 = vmul.f32 %v997_v1, %v981_v52 }
 0x7d0   : > { %v1003_v5 = vmul.f32 %v1299_v0, %v998_v3 }
 0x7d2   : > { %v1008_v6 = vadd.f32 %v1300_v4, %v1003_v5 }
 0x7d4   : > { %1009 = vst.msk [vmem:[%s479_s15] sm:$0xff] %vm514_vm0, %v1008_v6 }
 0x7d5   : > { %1410 = shalt.err (!%p1407_p1)
}
 0x7d6   : > { %1230 = dma.vmem_to_hbm [thread:$0]  (%p1581_p5), %s1029_s19, 128, %s1031_s22, %s1011_s17  }
 0x7d7 PF: > { %p1247_p2 = scmp.ge.s32.totalorder %s1453_s16, 2  ;;  %s1056_s26 = sand.u32 1, %s1441_s29  }
 0x7d8   : > { %s1057_s3 = scalar_lea.sflag [#allocation4], %s1056_s26 }
 0x7d9   : > { %p1239_p3 = pnand %p1247_p2, %p1585_p6 }
 0x7db   : > { %p1240_p4 = pneg %p1239_p3 }
 0x7dd   : > { %1432 = dma.done.wait (%p1240_p4), %s1057_s3, 128  }
 0x7de   : > { %1434 = vsyncadd (%p1240_p4), %s1057_s3, 4294967168  ;;  %s1067_s4 = scalar_lea.sflag [#allocation7], %s1056_s26 }
 0x7df   : > { %1436 = dma.done.wait (%p1240_p4), %s1067_s4, 128  }
 0x7e0   : > { %1438 = vsyncadd (%p1240_p4), %s1067_s4, 4294967168  ;;  %s1810_s16 = sld [smem:[#allocation12_spill]]  ;;  %s1813_s29 = smov %s1445_s30 }
 0x7e1   : > { %s1811_s28 = sld [smem:[#allocation11_spill]] }
 0x7e2   : > { %s1812_s15 = sld [smem:[#allocation13_spill]] }
 0x7e6   : > { %p29_p5 = scmp.ge.s32.totalorder %s1810_s16, 4  }
 0x7e7   : > { %s1814_s30 = smov %s1811_s28 }
 0x7e8   :  { %31 = sbr.rel (!%p29_p5) target bundleno = 13 (0xd), region = 129 }
 0x7ed   :  { %1073 = vsyncpa [#allocation3], 1 }
 0x7ee   :  { %1075 = vsyncpa [#allocation3 + $0x1], 1 }
 0x7ef   :  { %1076 = vsyncpa [#allocation4], 1 }
 0x7f0   :  { %1078 = vsyncpa [#allocation4 + $0x1], 1 }
 0x7f1   :  { %1079 = vsyncpa [#allocation7], 1 }
 0x7f2   :  { %1081 = vsyncpa [#allocation7 + $0x1], 1 }

</bundles_post_ra>
